<compile_context>
chip_gen: v7x
topology: tpu7x:2x2x1
jax: 0.10.0
libtpu: 0.0.40
codegen_flags: <defaults>
</compile_context>

<pallas_src>
import numpy as np
import jax
import jax.numpy as jnp
from jax.experimental import pallas as pl
from jax.experimental.pallas import tpu as pltpu


def _round_up(x, m):
    return ((x + m - 1) // m) * m


def _cdiv(a, b):
    return -(-a // b)


# ---------------------------------------------------------------------------
# Deterministic parameter construction (replaces librosa_mel_fn + hann_window)
# ---------------------------------------------------------------------------
def _hz_to_mel(f):
    # Slaney mel scale (librosa default, htk=False)
    f = np.asarray(f, dtype=np.float64)
    f_sp = 200.0 / 3.0
    mels = f / f_sp
    min_log_hz = 1000.0
    min_log_mel = min_log_hz / f_sp
    logstep = np.log(6.4) / 27.0
    log_region = f >= min_log_hz
    mels = np.where(log_region,
                    min_log_mel + np.log(np.maximum(f, 1e-10) / min_log_hz) / logstep,
                    mels)
    return mels


def _mel_to_hz(m):
    m = np.asarray(m, dtype=np.float64)
    f_sp = 200.0 / 3.0
    freqs = f_sp * m
    min_log_hz = 1000.0
    min_log_mel = min_log_hz / f_sp
    logstep = np.log(6.4) / 27.0
    log_region = m >= min_log_mel
    freqs = np.where(log_region, min_log_hz * np.exp(logstep * (m - min_log_mel)), freqs)
    return freqs


def librosa_mel_fn(sr, n_fft, n_mels, fmin, fmax):
    # Equivalent to librosa.filters.mel(sr, n_fft, n_mels, fmin, fmax), slaney norm.
    n_freq = n_fft // 2 + 1
    fftfreqs = np.linspace(0.0, sr / 2.0, n_freq)
    mel_pts = np.linspace(_hz_to_mel(fmin), _hz_to_mel(fmax), n_mels + 2)
    mel_f = _mel_to_hz(mel_pts)
    fdiff = np.diff(mel_f)
    ramps = mel_f[:, None] - fftfreqs[None, :]
    lower = -ramps[:-2] / fdiff[:-1, None]
    upper = ramps[2:] / fdiff[1:, None]
    weights = np.maximum(0.0, np.minimum(lower, upper))
    enorm = 2.0 / (mel_f[2: n_mels + 2] - mel_f[:n_mels])
    weights *= enorm[:, None]
    return weights.astype(np.float32)  # (n_mels, n_freq)


def hann_window(win_length):
    # torch.hann_window default: periodic=True
    n = np.arange(win_length, dtype=np.float64)
    return 0.5 - 0.5 * np.cos(2.0 * np.pi * n / win_length)


def folded_dft_basis(n_fft, window, n_freq_pad):
    # One-sided DFT bases with the analysis window folded in:
    #   (x * w) @ C == x @ (diag(w) @ C)   (mathematically exact)
    # Layout: [ w*cos | w*(-sin) ], each half zero-padded to n_freq_pad lanes.
    n_freq = n_fft // 2 + 1
    n = np.arange(n_fft, dtype=np.float64)[:, None]
    k = np.arange(n_freq, dtype=np.float64)[None, :]
    ang = 2.0 * np.pi * n * k / n_fft
    cos_b = np.cos(ang) * window[:, None]
    sin_b = -np.sin(ang) * window[:, None]
    basis = np.zeros((n_fft, 2 * n_freq_pad), dtype=np.float32)
    basis[:, :n_freq] = cos_b
    basis[:, n_freq_pad:n_freq_pad + n_freq] = sin_b
    return basis


# ---------------------------------------------------------------------------
# Pallas kernel: per (batch, frame-tile) framing -> STFT magnitude -> mel -> log10
# ---------------------------------------------------------------------------
def _audio2mel_kernel(span_ref, basis_ref, melT_ref, out_ref):
    # span_ref : (1, 1, span_rows, hop)   f32 audio rows (hop samples per row)
    # basis_ref: (n_fft, 2 * n_freq_pad)  [w*cos | w*(-sin)], zero padded (compute_dtype)
    # melT_ref : (n_freq_pad, n_mel_pad)  mel_basis.T, zero padded, float32
    # out_ref  : (1, n_mel_out, tile_frames)  log-mel, already transposed, float32
    n_fft = basis_ref.shape[0]
    two_n_freq_pad = basis_ref.shape[1]
    n_freq_pad = two_n_freq_pad // 2
    hop = span_ref.shape[3]
    r = n_fft // hop
    n_mel_out = out_ref.shape[1]
    tile_frames = out_ref.shape[2]
    cdt = basis_ref.dtype                      # bf16 (default) or f32

    # In-kernel framing: frame i of this tile is rows i .. i+r-1 of the span, so
    #   frames @ basis == sum_j span[j : j+tile_frames] @ basis[j*hop : (j+1)*hop].
    # Shifted slices are taken in f32 (cheap sublane shift); cast to bf16 only for
    # the MXU, accumulate in f32.
    span = span_ref[0, 0]                      # (span_rows, hop) f32
    acc = jnp.zeros((tile_frames, two_n_freq_pad), jnp.float32)
    for j in range(r):                         # static unroll; r = n_fft // hop (4)
        lhs = span[j:j + tile_frames, :].astype(cdt)
        rhs = basis_ref[pl.ds(j * hop, hop), :]
        acc = acc + jnp.dot(lhs, rhs, preferred_element_type=jnp.float32)

    real = acc[:, :n_freq_pad]                 # lane-aligned slices
    imag = acc[:, n_freq_pad:]
    mag = jnp.sqrt(real * real + imag * imag)  # keep elementwise math f32 (v5e-safe)

    # Mel projection; melT kept in float32 (tiny FLOPs, better accuracy near the
    # 1e-5 clamp).  Zero padding keeps the result exact.
    mel = jnp.dot(mag, melT_ref[...], preferred_element_type=jnp.float32)

    # Transpose in-kernel (XLU, idle relative to the MXU) so the HBM store is
    # lane-dense along the frames axis; drop the zero mel-padding sublanes here.
    log_mel = jnp.log10(jnp.maximum(mel.T[:n_mel_out, :], 1e-5))
    out_ref[0] = log_mel


class Audio2Mel:
    def __init__(self, n_fft=1024, hop_length=256, win_length=1024,
                 sampling_rate=16000, n_mel_channels=80, mel_fmin=80.0,
                 mel_fmax=7600, compute_dtype=jnp.bfloat16):
        assert win_length == n_fft, "kernel assumes win_length == n_fft (module default)"
        # TODO(synk): in-kernel framing assumes hop divides n_fft (true for the module
        # defaults); a generic hop would need per-frame DMA or wrapper-side framing.
        assert n_fft % hop_length == 0, "kernel assumes n_fft % hop_length == 0"
        self.n_fft = n_fft
        self.hop_length = hop_length
        self.win_length = win_length
        self.sampling_rate = sampling_rate
        self.n_mel_channels = n_mel_channels
        self.r = n_fft // hop_length
        self.n_freq = n_fft // 2 + 1
        # Lane / sublane friendly padded sizes.
        self.n_freq_pad = _round_up(self.n_freq, 128)
        self.n_mel_pad = _round_up(n_mel_channels, 128)
        self.n_mel_out = _round_up(n_mel_channels, 8)
        # bf16 matmul operands by default (f32 accumulation on the MXU); pass
        # compute_dtype=jnp.float32 to validate numerics against the PyTorch ref.
        self.compute_dtype = compute_dtype

        window = hann_window(win_length)
        self.basis = jnp.asarray(folded_dft_basis(n_fft, window, self.n_freq_pad),
                                 dtype=compute_dtype)            # (n_fft, 2*n_freq_pad)

        mel = librosa_mel_fn(sampling_rate, n_fft, n_mel_channels, mel_fmin, mel_fmax)
        melT = np.zeros((self.n_freq_pad, self.n_mel_pad), dtype=np.float32)
        melT[:self.n_freq, :n_mel_channels] = mel.T
        self.melT = jnp.asarray(melT, dtype=jnp.float32)         # kept f32 (accuracy)

        self._forward = jax.jit(self._forward_impl)              # fuse glue ops

    def __call__(self, audio):
        return self._forward(audio)

    def _forward_impl(self, audio):
        # audio: (B, 1, T) float32, matching the PyTorch module input.
        B, C, T = audio.shape
        assert C == 1
        n_fft, hop, r = self.n_fft, self.hop_length, self.r
        p = (n_fft - hop) // 2
        # PyTorch module: F.pad(audio, (p, p), 'constant') -> zero padding.
        x = jnp.pad(audio[:, 0, :].astype(jnp.float32), ((0, 0), (p, p)))
        L = T + 2 * p
        n_frames = 1 + (L - n_fft) // hop
        assert n_frames >= 1, "clip too short for one STFT frame"

        # ---- frames-axis tiling: 128 granularity, up to 512 frames per tile,
        # ---- and >= 2 grid programs whenever possible (v7x has 2 TensorCores).
        num_tiles = max(1, _cdiv(n_frames, 512))
        if B * num_tiles < 2 and n_frames > 128:
            num_tiles = 2
        tile_frames = _round_up(_cdiv(n_frames, num_tiles), 128)
        num_tiles = _cdiv(n_frames, tile_frames)
        n_frames_pad = num_tiles * tile_frames

        # ---- in-kernel framing input: hop-sized rows, one contiguous span per tile.
        # Each tile needs rows [t*tile_frames, t*tile_frames + tile_frames + r - 1);
        # the span gather duplicates only ~(r-1)/tile_frames (~0.6%) of the audio,
        # vs. the old per-frame gather's n_fft/hop (=4x) duplication.
        span_rows = _round_up(tile_frames + r - 1, 8)
        n_rows_total = max((num_tiles - 1) * tile_frames + span_rows, _cdiv(L, hop))
        x = jnp.pad(x, ((0, 0), (0, n_rows_total * hop - L)))
        x_rows = x.reshape(B, n_rows_total, hop)
        row_idx = (np.arange(num_tiles)[:, None] * tile_frames +
                   np.arange(span_rows)[None, :])                # (num_tiles, span_rows)
        spans = x_rows[:, row_idx, :]                            # (B, T_t, span_rows, hop)

        n_freq_pad, n_mel_pad, n_mel_out = self.n_freq_pad, self.n_mel_pad, self.n_mel_out

        flops = 2 * B * n_frames_pad * (n_fft * 2 * n_freq_pad + n_freq_pad * n_mel_pad)
        bytes_accessed = (spans.size * spans.dtype.itemsize
                          + self.basis.size * self.basis.dtype.itemsize
                          + self.melT.size * 4
                          + B * n_mel_out * n_frames_pad * 4)

        out = pl.pallas_call(
            _audio2mel_kernel,
            out_shape=jax.ShapeDtypeStruct((B, n_mel_out, n_frames_pad), jnp.float32),
            grid_spec=pltpu.PrefetchScalarGridSpec(
                num_scalar_prefetch=0,
                grid=(B, num_tiles),
                in_specs=[
                    # Per-tile audio span (no overlap between blocks -> plain BlockSpec
                    # auto-pipelining, no manual DMA needed).
                    pl.BlockSpec((1, 1, span_rows, hop), lambda b, t: (b, t, 0, 0)),
                    # Constant operands: constant index_map -> DMA'd once and reused;
                    # the default second buffer (~2.75 MiB bf16) is accepted within
                    # the 28 MiB VMEM budget below.
                    pl.BlockSpec((n_fft, 2 * n_freq_pad), lambda b, t: (0, 0)),
                    pl.BlockSpec((n_freq_pad, n_mel_pad), lambda b, t: (0, 0)),
                ],
                out_specs=pl.BlockSpec((1, n_mel_out, tile_frames),
                                       lambda b, t: (b, 0, t)),
            ),
            compiler_params=pltpu.CompilerParams(
                dimension_semantics=("parallel", "parallel"),
                vmem_limit_bytes=28 * 1024 * 1024,   # tight but safe on v5e/v6e/v7x
            ),
            cost_estimate=pl.CostEstimate(
                flops=int(flops),
                transcendentals=int(B * n_frames_pad * (n_freq_pad + n_mel_out)),
                bytes_accessed=int(bytes_accessed)),
        )(spans, self.basis, self.melT)

        # Already (B, n_mel_out, n_frames_pad); trim mel/frame padding.
        # (Padded frames produce log10(1e-5) = -5 columns in the raw kernel output;
        #  they are removed here and must not be consumed un-trimmed.)
        return out[:, :self.n_mel_channels, :n_frames]


if __name__ == "__main__":
    # Small shapes consistent with the module: n_fft=128, hop=32, n_mel=16.
    key = jax.random.PRNGKey(0)
    B, T = 2, 1024
    audio = jax.random.normal(key, (B, 1, T), dtype=jnp.float32)

    model = Audio2Mel(n_fft=128, hop_length=32, win_length=128,
                      sampling_rate=16000, n_mel_channels=16,
                      mel_fmin=80.0, mel_fmax=7600.0)

    log_mel = model(audio)
    jax.block_until_ready(log_mel)

    # Expected: (B, n_mel, n_frames) = (2, 16, 32)
    assert log_mel.shape == (2, 16, 32), log_mel.shape
    assert bool(jnp.all(jnp.isfinite(log_mel)))
    print("KERNEL_OK")
</pallas_src>

<mosaic_0001>
module attributes {stable_mosaic.version = 11 : i64} {
  func.func @_audio2mel_kernel(%arg0: i32, %arg1: i32, %arg2: memref<1x1x136x32xf32, #tpu.memory_space<vmem>>, %arg3: memref<128x256xbf16, #tpu.memory_space<vmem>>, %arg4: memref<128x128xf32, #tpu.memory_space<vmem>>, %arg5: memref<1x16x128xf32, #tpu.memory_space<vmem>>) attributes {dimension_semantics = [#tpu.dimension_semantics<parallel>, #tpu.dimension_semantics<parallel>], iteration_bounds = array<i64: 2, 1>, scalar_prefetch = 0 : i64, scratch_operands = 0 : i64, tpu.core_type = #tpu.core_type<tc>, window_params = [{transform_indices = @transform_0, window_bounds = array<i64: 1, 1, 136, 32>}, {pipeline_mode = #tpu.pipeline_mode<synchronous>, transform_indices = @transform_1, window_bounds = array<i64: 128, 256>}, {pipeline_mode = #tpu.pipeline_mode<synchronous>, transform_indices = @transform_2, window_bounds = array<i64: 128, 128>}, {transform_indices = @transform_3, window_bounds = array<i64: 1, 16, 128>}]} {
    %c0 = arith.constant 0 : index
    %c0_0 = arith.constant 0 : index
    %c0_1 = arith.constant 0 : index
    %c0_2 = arith.constant 0 : index
    %0 = vector.load %arg2[%c0, %c0_0, %c0_1, %c0_2] : memref<1x1x136x32xf32, #tpu.memory_space<vmem>>, vector<1x1x136x32xf32>
    %1 = vector.shape_cast %0 : vector<1x1x136x32xf32> to vector<136x32xf32>
    %cst = arith.constant 0.000000e+00 : f32
    %2 = vector.broadcast %cst : f32 to vector<128x256xf32>
    %3 = vector.extract_strided_slice %1 {offsets = [0, 0], sizes = [128, 32], strides = [1, 1]} : vector<136x32xf32> to vector<128x32xf32>
    %4 = arith.truncf %3 : vector<128x32xf32> to vector<128x32xbf16>
    %c0_3 = arith.constant 0 : index
    %c0_4 = arith.constant 0 : index
    %5 = vector.load %arg3[%c0_3, %c0_4] : memref<128x256xbf16, #tpu.memory_space<vmem>>, vector<32x256xbf16>
    %cst_5 = arith.constant dense<0.000000e+00> : vector<128x256xf32>
    %6 = tpu.matmul %4, %5, %cst_5 {dimension_numbers = #tpu.dot_dimension_numbers<[1], [0], [0], [1], [0, 0, 1, 1], [], []>} : vector<128x32xbf16>, vector<32x256xbf16>, vector<128x256xf32> -> vector<128x256xf32>
    %7 = arith.addf %2, %6 : vector<128x256xf32>
    %8 = vector.extract_strided_slice %1 {offsets = [1, 0], sizes = [128, 32], strides = [1, 1]} : vector<136x32xf32> to vector<128x32xf32>
    %9 = arith.truncf %8 : vector<128x32xf32> to vector<128x32xbf16>
    %c32 = arith.constant 32 : index
    %c0_6 = arith.constant 0 : index
    %10 = vector.load %arg3[%c32, %c0_6] : memref<128x256xbf16, #tpu.memory_space<vmem>>, vector<32x256xbf16>
    %cst_7 = arith.constant dense<0.000000e+00> : vector<128x256xf32>
    %11 = tpu.matmul %9, %10, %cst_7 {dimension_numbers = #tpu.dot_dimension_numbers<[1], [0], [0], [1], [0, 0, 1, 1], [], []>} : vector<128x32xbf16>, vector<32x256xbf16>, vector<128x256xf32> -> vector<128x256xf32>
    %12 = arith.addf %7, %11 : vector<128x256xf32>
    %13 = vector.extract_strided_slice %1 {offsets = [2, 0], sizes = [128, 32], strides = [1, 1]} : vector<136x32xf32> to vector<128x32xf32>
    %14 = arith.truncf %13 : vector<128x32xf32> to vector<128x32xbf16>
    %c64 = arith.constant 64 : index
    %c0_8 = arith.constant 0 : index
    %15 = vector.load %arg3[%c64, %c0_8] : memref<128x256xbf16, #tpu.memory_space<vmem>>, vector<32x256xbf16>
    %cst_9 = arith.constant dense<0.000000e+00> : vector<128x256xf32>
    %16 = tpu.matmul %14, %15, %cst_9 {dimension_numbers = #tpu.dot_dimension_numbers<[1], [0], [0], [1], [0, 0, 1, 1], [], []>} : vector<128x32xbf16>, vector<32x256xbf16>, vector<128x256xf32> -> vector<128x256xf32>
    %17 = arith.addf %12, %16 : vector<128x256xf32>
    %18 = vector.extract_strided_slice %1 {offsets = [3, 0], sizes = [128, 32], strides = [1, 1]} : vector<136x32xf32> to vector<128x32xf32>
    %19 = arith.truncf %18 : vector<128x32xf32> to vector<128x32xbf16>
    %c96 = arith.constant 96 : index
    %c0_10 = arith.constant 0 : index
    %20 = vector.load %arg3[%c96, %c0_10] : memref<128x256xbf16, #tpu.memory_space<vmem>>, vector<32x256xbf16>
    %cst_11 = arith.constant dense<0.000000e+00> : vector<128x256xf32>
    %21 = tpu.matmul %19, %20, %cst_11 {dimension_numbers = #tpu.dot_dimension_numbers<[1], [0], [0], [1], [0, 0, 1, 1], [], []>} : vector<128x32xbf16>, vector<32x256xbf16>, vector<128x256xf32> -> vector<128x256xf32>
    %22 = arith.addf %17, %21 : vector<128x256xf32>
    %23 = vector.extract_strided_slice %22 {offsets = [0, 0], sizes = [128, 128], strides = [1, 1]} : vector<128x256xf32> to vector<128x128xf32>
    %24 = vector.extract_strided_slice %22 {offsets = [0, 128], sizes = [128, 128], strides = [1, 1]} : vector<128x256xf32> to vector<128x128xf32>
    %25 = arith.mulf %23, %23 : vector<128x128xf32>
    %26 = arith.mulf %24, %24 : vector<128x128xf32>
    %27 = arith.addf %25, %26 : vector<128x128xf32>
    %28 = math.sqrt %27 : vector<128x128xf32>
    %c0_12 = arith.constant 0 : index
    %c0_13 = arith.constant 0 : index
    %29 = vector.load %arg4[%c0_12, %c0_13] : memref<128x128xf32, #tpu.memory_space<vmem>>, vector<128x128xf32>
    %cst_14 = arith.constant dense<0.000000e+00> : vector<128x128xf32>
    %30 = tpu.matmul %28, %29, %cst_14 {dimension_numbers = #tpu.dot_dimension_numbers<[1], [0], [0], [1], [0, 0, 1, 1], [], []>} : vector<128x128xf32>, vector<128x128xf32>, vector<128x128xf32> -> vector<128x128xf32>
    %31 = tpu.transpose %30, [1, 0] : vector<128x128xf32> -> vector<128x128xf32>
    %32 = vector.extract_strided_slice %31 {offsets = [0, 0], sizes = [16, 128], strides = [1, 1]} : vector<128x128xf32> to vector<16x128xf32>
    %cst_15 = arith.constant 9.99999974E-6 : f32
    %33 = vector.broadcast %cst_15 : f32 to vector<16x128xf32>
    %34 = arith.maximumf %32, %33 : vector<16x128xf32>
    %35 = math.log %34 : vector<16x128xf32>
    %cst_16 = arith.constant 0.434294492 : f32
    %36 = vector.broadcast %cst_16 : f32 to vector<16x128xf32>
    %37 = arith.mulf %35, %36 : vector<16x128xf32>
    %c0_17 = arith.constant 0 : index
    %c0_18 = arith.constant 0 : index
    %c0_19 = arith.constant 0 : index
    %38 = vector.load %arg5[%c0_17, %c0_18, %c0_19] : memref<1x16x128xf32, #tpu.memory_space<vmem>>, vector<1x16x128xf32>
    %39 = vector.shape_cast %38 : vector<1x16x128xf32> to vector<16x128xf32>
    %40 = vector.shape_cast %37 : vector<16x128xf32> to vector<1x16x128xf32>
    tpu.vector_store %arg5[%c0_17, %c0_18, %c0_19], %40 {strides = array<i32>} : memref<1x16x128xf32, #tpu.memory_space<vmem>>, vector<1x16x128xf32>,
    return
  }
  func.func @transform_0(%arg0: i32, %arg1: i32) -> (i32, i32, i32, i32) {
    %c0_i32 = arith.constant 0 : i32
    %c0_i32_0 = arith.constant 0 : i32
    %c0_i32_1 = arith.constant 0 : i32
    return %arg0, %arg1, %c0_i32, %c0_i32_0 : i32, i32, i32, i32
  }
  func.func @transform_1(%arg0: i32, %arg1: i32) -> (i32, i32) {
    %c0_i32 = arith.constant 0 : i32
    %c0_i32_0 = arith.constant 0 : i32
    %c0_i32_1 = arith.constant 0 : i32
    return %c0_i32, %c0_i32_0 : i32, i32
  }
  func.func @transform_2(%arg0: i32, %arg1: i32) -> (i32, i32) {
    %c0_i32 = arith.constant 0 : i32
    %c0_i32_0 = arith.constant 0 : i32
    %c0_i32_1 = arith.constant 0 : i32
    return %c0_i32, %c0_i32_0 : i32, i32
  }
  func.func @transform_3(%arg0: i32, %arg1: i32) -> (i32, i32, i32) {
    %c0_i32 = arith.constant 0 : i32
    %c0_i32_0 = arith.constant 0 : i32
    return %arg0, %c0_i32, %arg1 : i32, i32, i32
  }
}

</mosaic_0001>

<bundles_post_ra>
// kernel: _forward_impl.1
= control target key start
LH: loop header
LB: loop body
LE: loop exit
PB: predicated region body
PF: predicated region fallthrough
CT: control target
= control target key end

     0   :  { %8 = vsyncpa [#allocation3], 0  ;;  %s2593_s0 = inlined_call_operand.vmem [shape: f32[2,1,136,32], index: 0, kind: input, shape index: {}]   ;;  %s2594_s1 = inlined_call_operand.vmem [shape: bf16[128,256], index: 1, kind: input, shape index: {}]   ;;  %s2595_s2 = inlined_call_operand.vmem [shape: f32[128,128], index: 2, kind: input, shape index: {}]   ;;  %s2596_s3 = inlined_call_operand.hbm [shape: f32[2,16,128], index: 3, kind: output, shape index: {}]  }
   0x1   :  { %10 = vsyncpa [#allocation3 + $0x1], 0  ;;  %s2022_s12 = smov 0   ;;  %s2024_s13 = smov 0  }
   0x2   :  { %s2026_s14 = smov 0   ;;  %s2028_s15 = smov 0  }
   0x3   :  { %s2030_s16 = smov 0   ;;  %s2032_s17 = smov 0  }
   0x4 LB: > { %s1518_s18 = sadd.s32 4294967295, %s1996_s17   ;;  %s1519_s19 = sadd.s32 4294967294, %s1996_s17   ;;  %s1996_s17 = sphi %s2032_s17, %s16_s17   ;;  %s1992_s16 = sphi %s2030_s16, %s2603_s16   ;;  %s1988_s15 = sphi %s2028_s15, %s2602_s15   ;;  %s1984_s14 = sphi %s2026_s14, %s2601_s14   ;;  %s1980_s13 = sphi %s2024_s13, %s2600_s13   ;;  %s1976_s12 = sphi %s2022_s12, %s2599_s12  }
   0x5   : > { %s28_s20 = sadd.s32 1, %s1992_s16  ;;  %s107_s21 = sadd.s32 1, %s1984_s14 }
   0x6   : > { %p30_p0 = scmp.ge.s32.totalorder %s28_s20, 2  ;;  %p117_p1 = scmp.ne.s32.totalorder %s1984_s14, %s1980_s13 }
   0x7   : > { %p118_p2 = scmp.eq.s32.totalorder %s1518_s18, 1  ;;  %p123_p3 = scmp.ne.s32.totalorder %s1980_s13, %s1976_s12 }
   0x8   : > { %s2605_s20 = smov (%p30_p0, %s28_s20), 0  ;;  %p124_p5 = scmp.eq.s32.totalorder %s1519_s19, 1 }
   0x9   : > { %p2062_p4 = por %p118_p2, %p117_p1  ;;  %s102_s23 = ssub.s32 %s1992_s16, %s2605_s20 }
   0xa   : > { %p1522_p6 = scmp.ge.s32.totalorder %s1996_s17, 1  ;;  %p105_p7 = scmp.eq.s32.totalorder %s102_s23, 0 }
   0xb   : > { %p2069_p8 = por %p124_p5, %p123_p3  ;;  %p160_p9 = scmp.lt.s32.totalorder %s1996_s17, 3 }
   0xc   : > { %s2075_s25 = scalar_select %p105_p7, %s1984_s14, %s107_s21  }
   0xd   : > { %p161_p10 = pnand %p1522_p6, %p160_p9 }
   0xe   : > { %v1858_v0 = vld [vmem:[%s2594_s1 + $0x4] ss:$8 sps:$4 sm:$0xff] (!%p161_p10)   ;;  %p188_p11 = scmp.lt.s32.totalorder (!%p161_p10), %s1988_s15, 1  ;;  %v2084_v1 = vld [vmem:[%s2594_s1] ss:$8 sps:$4 sm:$0xff] (!%p161_p10)   ;;  %v1998_v2 = vmov (!%p161_p10), 0  }
   0xf   : > { %164 = sbr.rel (%p161_p10) target bundleno = 725 (0x2d5), region = 32  ;;  %527 = vmatprep.mubr.bf16.mxu0 (!%p161_p10), %v1998_v2  ;;  %378 = vmatprep.mubr.bf16.mxu1 (!%p161_p10), %v1998_v2  ;;  %v2091_v3 = vld [vmem:[%s2594_s1 + $0x14] ss:$8 sps:$4 sm:$0xff] (!%p161_p10)   ;;  %v2096_v4 = vld [vmem:[%s2594_s1 + $0x10] ss:$8 sps:$4 sm:$0xff] (!%p161_p10)   ;;  %vm321_vm0 = vcmask (!%p161_p10), 261120  }
  0x10   : > { %495 = vmatprep.subr.bf16.mxu0 (!%p161_p10), %v1858_v0  ;;  %v1864_v5 = vld [vmem:[%s2594_s1 + $0x24] ss:$8 sps:$4 sm:$0xff] (!%p161_p10)   ;;  %v1866_v6 = vld [vmem:[%s2594_s1 + $0x20] ss:$8 sps:$4 sm:$0xff] (!%p161_p10)   ;;  %v1870_v9 = vld [vmem:[%s2594_s1 + $0x34] ss:$8 sps:$4 sm:$0xff] (!%p161_p10)  }
  0x11   : > { %496 = vmatpush1.bf16.msra.mxu0 (!%p161_p10), %v2084_v1  ;;  %346 = vmatprep.subr.bf16.mxu1 (!%p161_p10), %v1864_v5  ;;  %v1867_v7 = vld [vmem:[%s2594_s1 + $0x40] ss:$8 sps:$4 sm:$0xff] (!%p161_p10)   ;;  %v1869_v8 = vld [vmem:[%s2594_s1 + $0x44] ss:$8 sps:$4 sm:$0xff] (!%p161_p10)   ;;  %v1872_v10 = vld [vmem:[%s2594_s1 + $0x30] ss:$8 sps:$4 sm:$0xff] (!%p161_p10)  }
  0x12   : > { %497 = vmatprep.subr.bf16.mxu0 (!%p161_p10), %v2091_v3  ;;  %347 = vmatpush1.bf16.msra.mxu1 (!%p161_p10), %v1866_v6  ;;  %v1875_v17 = vld [vmem:[%s2594_s1 + $0x54] ss:$8 sps:$4 sm:$0xff] (!%p161_p10)   ;;  %v1873_v24 = vld [vmem:[%s2594_s1 + $0x50] ss:$8 sps:$4 sm:$0xff] (!%p161_p10)   ;;  %v1878_v28 = vld [vmem:[%s2594_s1 + $0x64] ss:$8 sps:$4 sm:$0xff] (!%p161_p10)  }
  0x13   : > { %348 = vmatprep.subr.bf16.mxu1 (!%p161_p10), %v1870_v9  ;;  %vm232_vm1 = vsmask.f32 (!%p161_p10), 7424  ;;  %vm621_vm2 = vcmask (!%p161_p10), 1046528   ;;  %v1876_v61 = vld [vmem:[%s2594_s1 + $0x60] ss:$8 sps:$4 sm:$0xff] (!%p161_p10)   ;;  %s185_s27 = sand.u32 (!%p161_p10), 1, %s1980_s13  }
  0x14   : > { %vm832_vm3 = vsmask.f32 (!%p161_p10), 6400  ;;  %s1523_s28 = sshll.u32 (!%p161_p10), %s185_s27, 4  ;;  %s1578_s4 = sshll.u32 (!%p161_p10), %s1988_s15, 8 }
  0x15   : > { %498 = vmatpush1.bf16.msra.mxu0 (!%p161_p10), %v2096_v4  ;;  %s2547_s8 = scalar_lea.sflag (!%p161_p10), [#allocation3], %s185_s27 }
  0x16   : > { %s189_s7 = scalar_select %p188_p11, %s1988_s15, 1  ;;  %683 = vmatprep.subr.bf16.mxu0 %v1869_v8  ;;  %349 = vmatpush1.bf16.msra.mxu1 %v1872_v10 }
  0x17   : > { %1699 = vmatprep.subr.bf16.mxu1 %v1858_v0  ;;  %s1999_s15 = smov [#allocation2]  }
  0x18   : > { %s1799_s18 = smul.u32 136, %s189_s7  ;;  %s2545_s7 = scalar_lea.hbm %s2596_s3, %s1578_s4 }
  0x19   : > { %s1922_s10 = sshll.u32 %s1999_s15, 4  ;;  %s1923_s10 = int_to_ptr.vmem [resolvable:$false] %s1922_s10 }
  0x1a   : > { %s2116_s29 = scalar_lea.vmem %s2593_s0, %s1799_s18  ;;  %s1924_s11 = scalar_lea.vmem %s1923_s10, 512 }
  0x1b   : > { %v198_v11 = vld [vmem:[%s2116_s29] sm:$0xff]  ;;  %v199_v12 = vld [vmem:[%s2116_s29 + $0x8] sm:$0xff]  ;;  %v200_v13 = vld [vmem:[%s2116_s29 + $0x10] sm:$0xff] }
  0x1c   : > { %v2128_v14 = vpack.c.bf16 %v199_v12, %v198_v11  ;;  %v201_v15 = vld [vmem:[%s2116_s29 + $0x18] sm:$0xff]  ;;  %v202_v18 = vld [vmem:[%s2116_s29 + $0x20] sm:$0xff]  ;;  %v203_v19 = vld [vmem:[%s2116_s29 + $0x28] sm:$0xff] }
  0x1d   : > { %v2131_v16 = vpack.c.bf16 %v201_v15, %v200_v13  ;;  %v2142_v22 = vpack.c.bf16 %v203_v19, %v202_v18  ;;  %v204_v25 = vld [vmem:[%s2116_s29 + $0x30] sm:$0xff]  ;;  %v205_v26 = vld [vmem:[%s2116_s29 + $0x38] sm:$0xff]  ;;  %v206_v34 = vld [vmem:[%s2116_s29 + $0x40] sm:$0xff] }
  0x1e   : > { %1541 = vmatmul.mubr.msk.bf16.vlgmr.msra.gmra.mrb[0].mxu0 %vm321_vm0, %v2128_v14  ;;  %v234_v20 = vshrl.u32 %v2128_v14, 16  ;;  %v236_v21 = vshll.u32 %v2128_v14, 16  ;;  %v2156_v33 = vpack.c.bf16 %v205_v26, %v204_v25  ;;  %v207_v35 = vld [vmem:[%s2116_s29 + $0x48] sm:$0xff]  ;;  %v208_v42 = vld [vmem:[%s2116_s29 + $0x50] sm:$0xff]  ;;  %v209_v43 = vld [vmem:[%s2116_s29 + $0x58] sm:$0xff]  ;;  %v622_v44 = vrot.slane %v2128_v14, 1 }
  0x1f   : > { %684 = vmatpush1.bf16.msra.mxu0 %v1867_v7  ;;  %v241_v23 = vshll.u32 %v2131_v16, 16  ;;  %537 = vmatprep.mubr.bf16.mxu0 %v1998_v2  ;;  %v245_v31 = vshrl.u32 %v2131_v16, 16  ;;  %v249_v32 = vshll.u32 %v2142_v22, 16  ;;  %v2162_v37 = vpack.c.bf16 %v207_v35, %v206_v34  ;;  %v210_v48 = vld [vmem:[%s2116_s29 + $0x60] sm:$0xff]  ;;  %v211_v49 = vld [vmem:[%s2116_s29 + $0x68] sm:$0xff]  ;;  %v212_v54 = vld [vmem:[%s2116_s29 + $0x70] sm:$0xff] }
  0x20   : > { %v238_v27 = vrot.slane %v236_v21, 1  ;;  %685 = vmatprep.subr.bf16.mxu0 %v1875_v17  ;;  %v253_v40 = vshrl.u32 %v2142_v22, 16  ;;  %v257_v41 = vshll.u32 %v2156_v33, 16  ;;  %v623_v45 = vrot.slane %v2131_v16, 1  ;;  %v213_v55 = vld [vmem:[%s2116_s29 + $0x78] sm:$0xff]  ;;  %v214_v63 = vld [vmem:[%s2116_s29 + $0x80] sm:$0xff] }
  0x21   : > { %v243_v29 = vrot.slane %v241_v23, 1  ;;  %v251_v39 = vrot.slane %v249_v32, 1  ;;  %v833_v46 = vrot.slane %v234_v20, 1  ;;  %v625_v47 = vrot.slane %v2142_v22, 1  ;;  %v1879_v14 = vld [vmem:[%s2594_s1 + $0x70] ss:$8 sps:$4 sm:$0xff]  }
  0x22   : > { %v239_v30 = vor.u32 %v238_v27, %v234_v20  ;;  %v834_v50 = vrot.slane %v236_v21, 2  ;;  %v837_v51 = vrot.slane %v241_v23, 2  ;;  %v265_v52 = vshll.u32 %v2162_v37, 16  ;;  %s187_s29 = scalar_lea.vmem [#allocation2], %s1523_s28 }
  0x23   : > { %686 = vmatpush1.bf16.msra.mxu0 %v1873_v24  ;;  %v247_v38 = vor.u32 %v245_v31, %v243_v29  ;;  %v2182_v53 = vpack.c.bf16 %v209_v43, %v208_v42  ;;  %v836_v57 = vrot.slane %v245_v31, 1  ;;  %v255_v58 = vor.u32 %v253_v40, %v251_v39  ;;  %s1437_s30 = sshll.u32 %s187_s29, 4  ;;  %s2540_s30 = int_to_ptr.vmem [resolvable:$true] %s1437_s30 }
  0x24   : > { %v244_v36 = vsel %vm232_vm1, %v239_v30, %v243_v29  ;;  %914 = vmatprep.subr.bf16.mxu0 %v1878_v28  ;;  %v259_v59 = vrot.slane %v257_v41, 1  ;;  %v624_v60 = vsel %vm621_vm2, %v622_v44, %v623_v45  ;;  %v2191_v62 = vpack.c.bf16 %v211_v49, %v210_v48  ;;  %s1918_s9 = scalar_lea.vmem %s2540_s30, 256  ;;  %p1925_p1 = scmp.lt.s32.totalorder %s2540_s30, %s1923_s10 }
  0x25   : > { %1529 = vmatmul.mubr.msk.bf16.vlgmr.msra.gmra.mrb[0].mxu1 %vm321_vm0, %v244_v36  ;;  %v252_v56 = vsel %vm232_vm1, %v247_v38, %v251_v39  ;;  %v626_v0 = vsel %vm621_vm2, %v623_v45, %v625_v47  ;;  %v2202_v5 = vpack.c.bf16 %v213_v55, %v212_v54  ;;  %v267_v6 = vrot.slane %v265_v52, 1  ;;  %p1919_p12 = scmp.ne.s32.totalorder %s2540_s30, %s1918_s9  ;;  %p1926_p2 = scmp.lt.s32.totalorder %s1924_s11, %s1918_s9 }
  0x26   : > { %1542 = vmatmul.mubr.msk.bf16.gmra.mrb[4].mxu0 %vm321_vm0, %v2131_v16  ;;  %388 = vmatprep.mubr.bf16.mxu1 %v1998_v2  ;;  %v269_v7 = vshrl.u32 %v2162_v37, 16  ;;  %v835_v8 = vor.u32 %v834_v50, %v833_v46  ;;  %v260_v9 = vsel %vm232_vm1, %v255_v58, %v259_v59  ;;  %v277_v10 = vshrl.u32 %v2182_v53, 16 }
  0x27   : > { %715 = vmatprep.mubr.bf16.mxu0 %v1998_v2  ;;  %1701 = vmatpush1.bf16.msra.mxu1 %v2084_v1  ;;  %v261_v1 = vshrl.u32 %v2156_v33, 16  ;;  %v2211_v11 = vpack.c.bf16 %v214_v63, %v214_v63  ;;  %v838_v12 = vor.u32 %v837_v51, %v836_v57  ;;  %v281_v13 = vshll.u32 %v2191_v62, 16  ;;  %p1920_p13 = pnand %p1919_p12, %p2062_p4  ;;  %p1927_p3 = por %p1926_p2, %p1925_p1 }
  0x28   : > { %1700 = vmatprep.subr.bf16.mxu1 %v2091_v3  ;;  %v1881_v3 = vld [vmem:[%s2594_s1 + $0x74] ss:$8 sps:$4 sm:$0xff]   ;;  %v285_v15 = vshrl.u32 %v2191_v62, 16  ;;  %v840_v16 = vrot.slane %v253_v40, 1  ;;  %v841_v17 = vrot.slane %v249_v32, 2  ;;  %v289_v18 = vshll.u32 %v2202_v5, 16 }
  0x29   : > { %v293_v19 = vshrl.u32 %v2202_v5, 16  ;;  %v2224_v20 = vsel %vm832_vm3, %v835_v8, %v838_v12  ;;  %v844_v21 = vrot.slane %v261_v1, 1  ;;  %v845_v24 = vrot.slane %v257_v41, 2  ;;  %p1921_p0 = pneg %p1920_p13 }
  0x2a   : > { %v842_v23 = vor.u32 %v841_v17, %v840_v16  ;;  %v848_v25 = vrot.slane %v269_v7, 1  ;;  %v849_v26 = vrot.slane %v265_v52, 2  ;;  %v297_v27 = vshll.u32 %v2211_v11, 16 }
  0x2b   : > { %1702 = vmatpush1.bf16.msra.mxu1 %v2096_v4  ;;  %v273_v4 = vshll.u32 %v2182_v53, 16  ;;  %v852_v28 = vrot.slane %v277_v10, 1  ;;  %v856_v30 = vrot.slane %v285_v15, 1  ;;  %v846_v32 = vor.u32 %v845_v24, %v844_v21  ;;  %v1224_v21 = vld [vmem:[%s2595_s2 + $0x28] sm:$0xff]  ;;  %p1928_p5 = pnand %p1927_p3, %p1921_p0 }
  0x2c   : > { %v2232_v31 = vsel %vm832_vm3, %v838_v12, %v842_v23  ;;  %v850_v34 = vor.u32 %v849_v26, %v848_v25  ;;  %v857_v35 = vrot.slane %v281_v13, 2  ;;  %v860_v38 = vrot.slane %v293_v19, 1  ;;  %v1227_v25 = vld [vmem:[%s2595_s2 + $0x40] sm:$0xff] }
  0x2d   : > { %1530 = vmatmul.mubr.msk.bf16.gmra.mrb[4].mxu1 %vm321_vm0, %v252_v56  ;;  %v853_v29 = vrot.slane %v273_v4, 2  ;;  %v861_v39 = vrot.slane %v289_v18, 2  ;;  %v864_v40 = vshrl.u32 %v2211_v11, 16  ;;  %v2239_v41 = vsel %vm832_vm3, %v842_v23, %v846_v32  ;;  %v1226_v23 = vld [vmem:[%s2595_s2 + $0x38] sm:$0xff] }
  0x2e   : > { %1553 = vmatmul.mubr.msk.bf16.vlgmr.msra.gmra.mrb[0].mxu0 %vm321_vm0, %v624_v60  ;;  %398 = vmatprep.mubr.bf16.mxu1 %v1998_v2  ;;  %v2242_v42 = vsel %vm832_vm3, %v846_v32, %v850_v34  ;;  %v858_v43 = vor.u32 %v857_v35, %v856_v30  ;;  %v867_v44 = vrot.slane %v297_v27, 2  ;;  %v263_v45 = vor.u32 %v261_v1, %v259_v59  ;;  %v1231_v30 = vld [vmem:[%s2595_s2 + $0x60] sm:$0xff]  ;;  %v1234_v35 = vld [vmem:[%s2595_s2 + $0x78] sm:$0xff] }
  0x2f   : > { %915 = vmatpush1.bf16.msra.mxu0 %v1876_v61  ;;  %725 = vmatprep.mubr.bf16.mxu0 %v1998_v2  ;;  %v854_v36 = vor.u32 %v853_v29, %v852_v28  ;;  %v862_v48 = vor.u32 %v861_v39, %v860_v38  ;;  %v866_v49 = vrot.slane %v864_v40, 1  ;;  %v627_v50 = vrot.slane %v2156_v33, 1  ;;  %v1230_v28 = vld [vmem:[%s2595_s2 + $0x58] sm:$0xff] }
  0x30   : > { %916 = vmatprep.subr.bf16.mxu0 %v1881_v3  ;;  %v268_v55 = vsel %vm232_vm1, %v263_v45, %v267_v6  ;;  %v271_v58 = vor.u32 %v269_v7, %v267_v6  ;;  %v275_v59 = vrot.slane %v273_v4, 1  ;;  %v629_v60 = vrot.slane %v2162_v37, 1 }
  0x31   : > { %v2249_v46 = vsel %vm832_vm3, %v850_v34, %v854_v36  ;;  %v2254_v51 = vsel %vm832_vm3, %v854_v36, %v858_v43  ;;  %v2257_v52 = vsel %vm832_vm3, %v858_v43, %v862_v48  ;;  %v868_v54 = vor.u32 %v867_v44, %v866_v49  ;;  %v1233_v34 = vld [vmem:[%s2595_s2 + $0x70] sm:$0xff] }
  0x32   : > { %v628_v57 = vsel %vm621_vm2, %v625_v47, %v627_v50  ;;  %v276_v61 = vsel %vm232_vm1, %v271_v58, %v275_v59  ;;  %v630_v63 = vsel %vm621_vm2, %v627_v50, %v629_v60  ;;  %v279_v47 = vor.u32 %v277_v10, %v275_v59 }
  0x33   : > { %917 = vmatpush1.bf16.msra.mxu0 %v1879_v14  ;;  %v2261_v56 = vsel %vm832_vm3, %v862_v48, %v868_v54  ;;  %v631_v1 = vrot.slane %v2182_v53, 1  ;;  %v291_v4 = vrot.slane %v289_v18, 1  ;;  %v633_v8 = vrot.slane %v2191_v62, 1 }
  0x34   : > { %v635_v14 = vrot.slane %v2202_v5, 1  ;;  %v637_v17 = vrot.slane %v2211_v11, 1  ;;  %v1222_v11 = vld [vmem:[%s2595_s2 + $0x18] sm:$0xff]  ;;  %v1695_v36 = vpack.c.bf16 %v1234_v35, %v1233_v34 }
  0x35   : > { %1531 = vmatmul.mubr.msk.bf16.gmra.mrb[8].mxu1 %vm321_vm0, %v260_v9  ;;  %v632_v6 = vsel %vm621_vm2, %v629_v60, %v631_v1  ;;  %v634_v10 = vsel %vm621_vm2, %v631_v1, %v633_v8  ;;  %v295_v12 = vor.u32 %v293_v19, %v291_v4 }
  0x36   : > { %1554 = vmatmul.mubr.msk.bf16.gmra.mrb[4].mxu0 %vm321_vm0, %v626_v0  ;;  %408 = vmatprep.mubr.bf16.mxu1 %v1998_v2  ;;  %v283_v0 = vrot.slane %v281_v13, 1  ;;  %v299_v13 = vrot.slane %v297_v27, 1  ;;  %v636_v16 = vsel %vm621_vm2, %v633_v8, %v635_v14  ;;  %v638_v18 = vsel %vm621_vm2, %v635_v14, %v637_v17  ;;  %v1229_v27 = vld [vmem:[%s2595_s2 + $0x50] sm:$0xff] }
  0x37   : > { %735 = vmatprep.mubr.bf16.mxu0 %v1998_v2  ;;  %v1687_v29 = vpack.c.bf16 %v1230_v28, %v1229_v27 }
  0x38   : > { %v284_v3 = vsel %vm232_vm1, %v279_v47, %v283_v0  ;;  %v287_v7 = vor.u32 %v285_v15, %v283_v0  ;;  %v300_v15 = vsel %vm232_vm1, %v295_v12, %v299_v13 }
  0x3a   : > { %v292_v9 = vsel %vm232_vm1, %v287_v7, %v291_v4 }
  0x3d   : > { %1532 = vmatmul.mubr.msk.bf16.gmra.mrb[12].mxu1 %vm321_vm0, %v268_v55 }
  0x3e   : > { %1555 = vmatmul.mubr.msk.bf16.gmra.mrb[8].mxu0 %vm321_vm0, %v628_v57  ;;  %418 = vmatprep.mubr.bf16.mxu1 %v1998_v2 }
  0x3f   : > { %745 = vmatprep.mubr.bf16.mxu0 %v1998_v2 }
  0x45   : > { %1533 = vmatmul.mubr.msk.bf16.gmra.mrb[16].mxu1 %vm321_vm0, %v276_v61 }
  0x46   : > { %1556 = vmatmul.mubr.msk.bf16.gmra.mrb[12].mxu0 %vm321_vm0, %v630_v63  ;;  %428 = vmatprep.mubr.bf16.mxu1 %v1998_v2 }
  0x47   : > { %755 = vmatprep.mubr.bf16.mxu0 %v1998_v2 }
  0x4d   : > { %1534 = vmatmul.mubr.msk.bf16.gmra.mrb[20].mxu1 %vm321_vm0, %v284_v3 }
  0x4e   : > { %1557 = vmatmul.mubr.msk.bf16.gmra.mrb[16].mxu0 %vm321_vm0, %v632_v6  ;;  %438 = vmatprep.mubr.bf16.mxu1 %v1998_v2 }
  0x4f   : > { %765 = vmatprep.mubr.bf16.mxu0 %v1998_v2 }
  0x55   : > { %1535 = vmatmul.mubr.msk.bf16.gmra.mrb[24].mxu1 %vm321_vm0, %v292_v9 }
  0x56   : > { %1558 = vmatmul.mubr.msk.bf16.gmra.mrb[20].mxu0 %vm321_vm0, %v634_v10  ;;  %448 = vmatprep.mubr.bf16.mxu1 %v1998_v2 }
  0x57   : > { %775 = vmatprep.mubr.bf16.mxu0 %v1998_v2 }
  0x5d   : > { %1536 = vmatmul.mubr.msk.bf16.gmra.mrb[28].mxu1 %vm321_vm0, %v300_v15 }
  0x5e   : > { %1559 = vmatmul.mubr.msk.bf16.gmra.mrb[24].mxu0 %vm321_vm0, %v636_v16  ;;  %547 = vmatprep.mubr.bf16.mxu1 %v1998_v2 }
  0x5f   : > { %785 = vmatprep.mubr.bf16.mxu0 %v1998_v2 }
  0x65   : > { %1543 = vmatmul.mubr.msk.bf16.vlgmr.msra.gmra.mrb[8].mxu1 %vm321_vm0, %v2142_v22  ;;  %v1219_v22 = vld [vmem:[%s2595_s2] sm:$0xff] }
  0x66   : > { %1560 = vmatmul.mubr.msk.bf16.gmra.mrb[28].mxu0 %vm321_vm0, %v638_v18  ;;  %557 = vmatprep.mubr.bf16.mxu1 %v1998_v2 }
  0x67   : > { %946 = vmatprep.mubr.bf16.mxu0 %v1998_v2 }
  0x6d   : > { %1544 = vmatmul.mubr.msk.bf16.gmra.mrb[12].mxu1 %vm321_vm0, %v2156_v33  ;;  %v1220_v33 = vld [vmem:[%s2595_s2 + $0x8] sm:$0xff] }
  0x6e   : > { %1565 = vmatmul.mubr.msk.bf16.vlgmr.msra.gmra.mrb[0].mxu0 %vm321_vm0, %v2224_v20  ;;  %567 = vmatprep.mubr.bf16.mxu1 %v1998_v2  ;;  %v1223_v20 = vld [vmem:[%s2595_s2 + $0x20] sm:$0xff] }
  0x6f   : > { %956 = vmatprep.mubr.bf16.mxu0 %v1998_v2 }
  0x75   : > { %1545 = vmatmul.mubr.msk.bf16.gmra.mrb[16].mxu1 %vm321_vm0, %v2162_v37  ;;  %v1221_v37 = vld [vmem:[%s2595_s2 + $0x10] sm:$0xff] }
  0x76   : > { %1566 = vmatmul.mubr.msk.bf16.gmra.mrb[4].mxu0 %vm321_vm0, %v2232_v31  ;;  %577 = vmatprep.mubr.bf16.mxu1 %v1998_v2  ;;  %v1671_v19 = vpack.c.bf16 %v1222_v11, %v1221_v37  ;;  %v1232_v31 = vld [vmem:[%s2595_s2 + $0x68] sm:$0xff] }
  0x77   : > { %966 = vmatprep.mubr.bf16.mxu0 %v1998_v2  ;;  %v1691_v32 = vpack.c.bf16 %v1232_v31, %v1231_v30 }
  0x7d   : > { %1546 = vmatmul.mubr.msk.bf16.gmra.mrb[20].mxu1 %vm321_vm0, %v2182_v53  ;;  %v1667_v53 = vpack.c.bf16 %v1220_v33, %v1219_v22 }
  0x7e   : > { %1567 = vmatmul.mubr.msk.bf16.gmra.mrb[8].mxu0 %vm321_vm0, %v2239_v41  ;;  %587 = vmatprep.mubr.bf16.mxu1 %v1998_v2 }
  0x7f   : > { %976 = vmatprep.mubr.bf16.mxu0 %v1998_v2  ;;  %1668 = vmatprep.subr.bf16.mxu1 %v1667_v53 }
  0x80   : > { %1670 = vmatpush3.bf16.msra.mxu1 %v1667_v53 }
  0x81   : > { %1672 = vmatprep.subr.bf16.mxu1 %v1671_v19 }
  0x84   : > { %1674 = vmatpush3.bf16.msra.mxu1 %v1671_v19 }
  0x85   : > { %1547 = vmatmul.mubr.msk.bf16.gmra.mrb[24].mxu1 %vm321_vm0, %v2191_v62  ;;  %v1675_v62 = vpack.c.bf16 %v1224_v21, %v1223_v20 }
  0x86   : > { %1568 = vmatmul.mubr.msk.bf16.gmra.mrb[12].mxu0 %vm321_vm0, %v2242_v42  ;;  %597 = vmatprep.mubr.bf16.mxu1 %v1998_v2 }
  0x87   : > { %986 = vmatprep.mubr.bf16.mxu0 %v1998_v2  ;;  %1676 = vmatprep.subr.bf16.mxu1 %v1675_v62 }
  0x88   : > { %1678 = vmatpush3.bf16.msra.mxu1 %v1675_v62 }
  0x8d   : > { %1548 = vmatmul.mubr.msk.bf16.gmra.mrb[28].mxu1 %vm321_vm0, %v2202_v5  ;;  %v1225_v5 = vld [vmem:[%s2595_s2 + $0x30] sm:$0xff] }
  0x8e   : > { %1569 = vmatmul.mubr.msk.bf16.gmra.mrb[16].mxu0 %vm321_vm0, %v2249_v46  ;;  %v1679_v24 = vpack.c.bf16 %v1226_v23, %v1225_v5 }
  0x8f   : > { %996 = vmatprep.mubr.bf16.mxu0 %v1998_v2 }
  0x90   : > { %1680 = vmatprep.subr.bf16.mxu1 %v1679_v24 }
  0x91   : > { %1682 = vmatpush3.bf16.msra.mxu1 %v1679_v24 }
  0x96   : > { %1570 = vmatmul.mubr.msk.bf16.gmra.mrb[20].mxu0 %vm321_vm0, %v2254_v51 }
  0x97   : > { %1006 = vmatprep.mubr.bf16.mxu0 %v1998_v2 }
  0x9e   : > { %1571 = vmatmul.mubr.msk.bf16.gmra.mrb[24].mxu0 %vm321_vm0, %v2257_v52 }
  0x9f   : > { %1016 = vmatprep.mubr.bf16.mxu0 %v1998_v2  ;;  %v1228_v2 = vld [vmem:[%s2595_s2 + $0x48] sm:$0xff] }
  0xa0   : > { %v1683_v26 = vpack.c.bf16 %v1228_v2, %v1227_v25 }
  0xa2   : > { %1684 = vmatprep.subr.bf16.mxu1 %v1683_v26 }
  0xa3   : > { %1686 = vmatpush3.bf16.msra.mxu1 %v1683_v26 }
  0xa4   : > { %1688 = vmatprep.subr.bf16.mxu1 %v1687_v29 }
  0xa6   : > { %1572 = vmatmul.mubr.msk.bf16.gmra.mrb[28].mxu0 %vm321_vm0, %v2261_v56 }
  0xa7   : > { %1690 = vmatpush3.bf16.msra.mxu1 %v1687_v29 }
  0xa8   : > { %1692 = vmatprep.subr.bf16.mxu1 %v1691_v32 }
  0xab   : > { %1694 = vmatpush3.bf16.msra.mxu1 %v1691_v32 }
  0xac   : > { %1696 = vmatprep.subr.bf16.mxu1 %v1695_v36 }
  0xaf   : > { %1698 = vmatpush3.bf16.msra.mxu1 %v1695_v36 }
  0xf8   : > { %v380_v38 = vpop.f32.mrb[0].mxu1 }
  0xf9   : > { %v382_v39 = vpop.f32.mrb[1].mxu1 }
  0xfa   : > { %v384_v40 = vpop.f32.mrb[2].mxu1 }
  0xfb   : > { %v386_v41 = vpop.f32.mrb[3].mxu1 }
 0x100   : > { %v390_v42 = vpop.f32.mrb[4].mxu1 }
 0x101   : > { %v392_v43 = vpop.f32.mrb[5].mxu1 }
 0x102   : > { %v394_v44 = vpop.f32.mrb[6].mxu1 }
 0x103   : > { %v396_v45 = vpop.f32.mrb[7].mxu1 }
 0x138   : > { %v549_v46 = vpop.f32.mrb[8].mxu1 }
 0x139   : > { %v551_v48 = vpop.f32.mrb[9].mxu1 }
 0x13a   : > { %v553_v49 = vpop.f32.mrb[10].mxu1 }
 0x13b   : > { %v555_v50 = vpop.f32.mrb[11].mxu1 }
 0x140   : > { %v2398_v51 = vpop.f32.mrb[12].mxu1 }
 0x141   : > { %v2400_v52 = vpop.f32.mrb[13].mxu1  ;;  %v948_v54 = vpop.f32.mrb[0].mxu0 }
 0x142   : > { %v2402_v55 = vpop.f32.mrb[14].mxu1  ;;  %v1703_v56 = vadd.f32 %v948_v54, %v380_v38  ;;  %v950_v57 = vpop.f32.mrb[1].mxu0 }
 0x143   : > { %v2404_v58 = vpop.f32.mrb[15].mxu1  ;;  %v1704_v59 = vadd.f32 %v950_v57, %v382_v39  ;;  %v952_v60 = vpop.f32.mrb[2].mxu0 }
 0x144   : > { %v1059_v61 = vmul.f32 %v1703_v56, %v1703_v56  ;;  %v1705_v63 = vadd.f32 %v952_v60, %v384_v40  ;;  %v954_v47 = vpop.f32.mrb[3].mxu0 }
 0x145   : > { %v1075_v0 = vmul.f32 %v1704_v59, %v1704_v59  ;;  %v1706_v1 = vadd.f32 %v954_v47, %v386_v41 }
 0x146   : > { %v1060_v3 = vmul.f32 %v1705_v63, %v1705_v63 }
 0x147   : > { %v1091_v6 = vadd.f32 %v1075_v0, %v1059_v61  ;;  %v1076_v7 = vmul.f32 %v1706_v1, %v1706_v1 }
 0x148   : > { %v2406_v4 = vpop.f32.mrb[16].mxu1 }
 0x149   : > { %v1092_v8 = vadd.f32 %v1076_v7, %v1060_v3  ;;  %v2408_v9 = vpop.f32.mrb[17].mxu1  ;;  %v958_v10 = vpop.f32.mrb[4].mxu0  ;;  %1882 = vrsqrt.f32 %v1091_v6  ;;  %vm1109_vm4 = vcmp.eq.f32.partialorder %v1091_v6, inf  ;;  %vm1111_vm5 = vcmp.eq.f32.partialorder %v1091_v6, 0.0 }
 0x14a   : > { %v2410_v12 = vpop.f32.mrb[18].mxu1  ;;  %v1707_v13 = vadd.f32 %v958_v10, %v390_v42  ;;  %v960_v14 = vpop.f32.mrb[5].mxu0  ;;  %v1112_v39 = vand.u32 2147483648, %v1091_v6 }
 0x14b   : > { %1884 = vrsqrt.f32 %v1092_v8  ;;  %v2412_v15 = vpop.f32.mrb[19].mxu1  ;;  %v1708_v16 = vadd.f32 %v960_v14, %v392_v43  ;;  %v962_v17 = vpop.f32.mrb[6].mxu0  ;;  %vm1116_vm6 = vcmp.eq.f32.partialorder %v1092_v8, inf  ;;  %vm1118_vm7 = vcmp.eq.f32.partialorder %v1092_v8, 0.0 }
 0x14c   : > { %v1061_v18 = vmul.f32 %v1707_v13, %v1707_v13  ;;  %v1709_v22 = vadd.f32 %v962_v17, %v394_v44  ;;  %v964_v33 = vpop.f32.mrb[7].mxu0 }
 0x14d   : > { %v1077_v37 = vmul.f32 %v1708_v16, %v1708_v16  ;;  %v1710_v53 = vadd.f32 %v964_v33, %v396_v45 }
 0x14e   : > { %v1062_v11 = vmul.f32 %v1709_v22, %v1709_v22 }
 0x14f   : > { %v2414_v19 = vadd.f32 %v1077_v37, %v1061_v18  ;;  %v1078_v20 = vmul.f32 %v1710_v53, %v1710_v53 }
 0x150   : > { %v2416_v21 = vpop.f32.mrb[20].mxu1 }
 0x151   : > { %v2418_v62 = vadd.f32 %v1078_v20, %v1062_v11  ;;  %v2420_v5 = vpop.f32.mrb[21].mxu1  ;;  %v968_v23 = vpop.f32.mrb[8].mxu0  ;;  %1886 = vrsqrt.f32 %v2414_v19  ;;  %vm1123_vm8 = vcmp.eq.f32.partialorder %v2414_v19, inf  ;;  %vm1125_vm9 = vcmp.eq.f32.partialorder %v2414_v19, 0.0 }
 0x152   : > { %v2423_v24 = vpop.f32.mrb[22].mxu1  ;;  %v1711_v25 = vadd.f32 %v968_v23, %v549_v46  ;;  %v970_v2 = vpop.f32.mrb[9].mxu0  ;;  %v1119_v46 = vand.u32 2147483648, %v1092_v8  ;;  %v1126_v14 = vand.u32 2147483648, %v2414_v19 }
 0x153   : > { %v1883_v26 = vpop.eup %1882  ;;  %v2425_v27 = vpop.f32.mrb[23].mxu1  ;;  %v1712_v28 = vadd.f32 %v970_v2, %v551_v48  ;;  %1888 = vrsqrt.f32 %v2418_v62  ;;  %vm1130_vm10 = vcmp.eq.f32.partialorder %v2418_v62, inf  ;;  %v1133_v33 = vand.u32 2147483648, %v2418_v62 }
 0x154   : > { %v972_v29 = vpop.f32.mrb[10].mxu0  ;;  %v1063_v30 = vmul.f32 %v1711_v25, %v1711_v25  ;;  %v1108_v34 = vmul.f32 %v1883_v26, %v1091_v6  ;;  %vm1132_vm11 = vcmp.eq.f32.partialorder %v2418_v62, 0.0 }
 0x155   : > { %v1713_v31 = vadd.f32 %v972_v29, %v553_v49  ;;  %v974_v32 = vpop.f32.mrb[11].mxu0  ;;  %v1885_v35 = vpop.eup %1884  ;;  %v1079_v36 = vmul.f32 %v1712_v28, %v1712_v28 }
 0x156   : > { %v1714_v38 = vadd.f32 %v974_v32, %v555_v50  ;;  %v1110_v41 = vsel %vm1109_vm4, %v1091_v6, %v1108_v34  ;;  %v1115_v42 = vmul.f32 %v1885_v35, %v1092_v8 }
 0x157   : > { %v1064_v40 = vmul.f32 %v1713_v31, %v1713_v31  ;;  %v2428_v43 = vadd.f32 %v1079_v36, %v1063_v30  ;;  %v1113_v45 = vsel %vm1111_vm5, %v1112_v39, %v1110_v41 }
 0x158   : > { %v1080_v44 = vmul.f32 %v1714_v38, %v1714_v38  ;;  %v2430_v48 = vpop.f32.mrb[24].mxu1  ;;  %1643 = vmatprep.mubr.f32.mxu1 %v1113_v45  ;;  %v1117_v49 = vsel %vm1116_vm6, %v1092_v8, %v1115_v42 }
 0x159   : > { %v2434_v56 = vpop.f32.mrb[25].mxu1  ;;  %v978_v50 = vpop.f32.mrb[12].mxu0  ;;  %v1120_v57 = vsel %vm1118_vm7, %v1119_v46, %v1117_v49  ;;  %1890 = vrsqrt.f32 %v2428_v43  ;;  %vm1137_vm12 = vcmp.eq.f32.partialorder %v2428_v43, inf  ;;  %vm1139_vm13 = vcmp.eq.f32.partialorder %v2428_v43, 0.0 }
 0x15a   : > { %v2432_v54 = vadd.f32 %v1080_v44, %v1064_v40  ;;  %v2437_v59 = vpop.f32.mrb[26].mxu1  ;;  %v1715_v60 = vadd.f32 %v978_v50, %v2398_v51  ;;  %v980_v61 = vpop.f32.mrb[13].mxu0  ;;  %1644 = vmatmul.mubr.f32.vlgmr.msra.gmra.mrb[32].mxu1 %v1120_v57  ;;  %v1140_v38 = vand.u32 2147483648, %v2428_v43 }
 0x15b   : > { %v1887_v63 = vpop.eup %1886  ;;  %v2440_v47 = vpop.f32.mrb[27].mxu1  ;;  %v1716_v0 = vadd.f32 %v980_v61, %v2400_v52 }
 0x15c   : > { %v982_v1 = vpop.f32.mrb[14].mxu0  ;;  %1892 = vrsqrt.f32 %v2432_v54  ;;  %v1065_v3 = vmul.f32 %v1715_v60, %v1715_v60  ;;  %v1122_v8 = vmul.f32 %v1887_v63, %v2414_v19  ;;  %vm1144_vm14 = vcmp.eq.f32.partialorder %v2432_v54, inf }
 0x15d   : > { %v1717_v6 = vadd.f32 %v982_v1, %v2402_v55  ;;  %v984_v7 = vpop.f32.mrb[15].mxu0  ;;  %v1889_v10 = vpop.eup %1888  ;;  %v1081_v51 = vmul.f32 %v1716_v0, %v1716_v0  ;;  %v1147_v44 = vand.u32 2147483648, %v2432_v54  ;;  %vm1146_vm15 = vcmp.eq.f32.partialorder %v2432_v54, 0.0 }
 0x15e   : > { %v1718_v13 = vadd.f32 %v984_v7, %v2404_v58  ;;  %v1124_v16 = vsel %vm1123_vm8, %v2414_v19, %v1122_v8  ;;  %v1129_v17 = vmul.f32 %v1889_v10, %v2418_v62 }
 0x15f   : > { %v1066_v52 = vmul.f32 %v1717_v6, %v1717_v6  ;;  %v2453_v55 = vadd.f32 %v1081_v51, %v1065_v3  ;;  %v1127_v22 = vsel %vm1125_vm9, %v1126_v14, %v1124_v16 }
 0x160   : > { %v1082_v18 = vmul.f32 %v1718_v13, %v1718_v13  ;;  %v2456_v37 = vpop.f32.mrb[28].mxu1  ;;  %1646 = vmatprep.mubr.f32.mxu1 %v1127_v22  ;;  %v1131_v58 = vsel %vm1130_vm10, %v2418_v62, %v1129_v17 }
 0x161   : > { %v2462_v11 = vpop.f32.mrb[29].mxu1  ;;  %v988_v19 = vpop.f32.mrb[16].mxu0  ;;  %v1134_v20 = vsel %vm1132_vm11, %v1133_v33, %v1131_v58  ;;  %1894 = vrsqrt.f32 %v2453_v55  ;;  %vm1151_vm0 = vcmp.eq.f32.partialorder %v2453_v55, inf  ;;  %vm1153_vm1 = vcmp.eq.f32.partialorder %v2453_v55, 0.0 }
 0x162   : > { %v2460_v53 = vadd.f32 %v1082_v18, %v1066_v52  ;;  %v2465_v23 = vpop.f32.mrb[30].mxu1  ;;  %v1719_v25 = vadd.f32 %v988_v19, %v2406_v4  ;;  %v990_v2 = vpop.f32.mrb[17].mxu0  ;;  %1647 = vmatmul.mubr.f32.gmra.mrb[34].mxu1 %v1134_v20  ;;  %v1154_v7 = vand.u32 2147483648, %v2453_v55 }
 0x163   : > { %v1891_v26 = vpop.eup %1890  ;;  %v2468_v28 = vpop.f32.mrb[31].mxu1  ;;  %v1720_v29 = vadd.f32 %v990_v2, %v2408_v9 }
 0x164   : > { %v992_v62 = vpop.f32.mrb[18].mxu0  ;;  %1896 = vrsqrt.f32 %v2460_v53  ;;  %v1067_v30 = vmul.f32 %v1719_v25, %v1719_v25  ;;  %v1136_v34 = vmul.f32 %v1891_v26, %v2428_v43  ;;  %vm1158_vm2 = vcmp.eq.f32.partialorder %v2460_v53, inf }
 0x165   : > { %v1721_v31 = vadd.f32 %v992_v62, %v2410_v12  ;;  %v994_v32 = vpop.f32.mrb[19].mxu0  ;;  %v1083_v4 = vmul.f32 %v1720_v29, %v1720_v29  ;;  %v1161_v14 = vand.u32 2147483648, %v2460_v53  ;;  %vm1160_vm3 = vcmp.eq.f32.partialorder %v2460_v53, 0.0 }
 0x166   : > { %v1893_v35 = vpop.eup %1892  ;;  %v1722_v36 = vadd.f32 %v994_v32, %v2412_v15  ;;  %v1138_v39 = vsel %vm1137_vm12, %v2428_v43, %v1136_v34 }
 0x167   : > { %v1068_v9 = vmul.f32 %v1721_v31, %v1721_v31  ;;  %v1143_v40 = vmul.f32 %v1893_v35, %v2432_v54  ;;  %v2481_v12 = vadd.f32 %v1083_v4, %v1067_v30  ;;  %v1141_v42 = vsel %vm1139_vm13, %v1140_v38, %v1138_v39 }
 0x168   : > { %v1084_v41 = vmul.f32 %v1722_v36, %v1722_v36  ;;  %1649 = vmatprep.mubr.f32.mxu1 %v1141_v42 }
 0x169   : > { %v1145_v15 = vsel %vm1144_vm14, %v2432_v54, %v1143_v40  ;;  %v998_v46 = vpop.f32.mrb[20].mxu0  ;;  %1898 = vrsqrt.f32 %v2481_v12  ;;  %vm1165_vm4 = vcmp.eq.f32.partialorder %v2481_v12, inf  ;;  %vm1167_vm5 = vcmp.eq.f32.partialorder %v2481_v12, 0.0 }
 0x16a   : > { %v2486_v45 = vadd.f32 %v1084_v41, %v1068_v9  ;;  %v1148_v49 = vsel %vm1146_vm15, %v1147_v44, %v1145_v15  ;;  %v1723_v43 = vadd.f32 %v998_v46, %v2416_v21  ;;  %v1000_v50 = vpop.f32.mrb[21].mxu0  ;;  %v1168_v29 = vand.u32 2147483648, %v2481_v12 }
 0x16b   : > { %1650 = vmatmul.mubr.f32.gmra.mrb[36].mxu1 %v1148_v49  ;;  %v1895_v57 = vpop.eup %1894  ;;  %v1724_v60 = vadd.f32 %v1000_v50, %v2420_v5  ;;  %v1002_v61 = vpop.f32.mrb[22].mxu0 }
 0x16c   : > { %1900 = vrsqrt.f32 %v2486_v45  ;;  %v1069_v63 = vmul.f32 %v1723_v43, %v1723_v43  ;;  %v1725_v0 = vadd.f32 %v1002_v61, %v2423_v24  ;;  %v1004_v54 = vpop.f32.mrb[23].mxu0  ;;  %v1150_v1 = vmul.f32 %v1895_v57, %v2453_v55 }
 0x16d   : > { %v1085_v6 = vmul.f32 %v1724_v60, %v1724_v60  ;;  %v1726_v21 = vadd.f32 %v1004_v54, %v2425_v27  ;;  %vm1172_vm6 = vcmp.eq.f32.partialorder %v2486_v45, inf  ;;  %v1175_v34 = vand.u32 2147483648, %v2486_v45 }
 0x16e   : > { %v1897_v3 = vpop.eup %1896  ;;  %v1070_v5 = vmul.f32 %v1725_v0, %v1725_v0  ;;  %v1152_v8 = vsel %vm1151_vm0, %v2453_v55, %v1150_v1  ;;  %vm1174_vm7 = vcmp.eq.f32.partialorder %v2486_v45, 0.0 }
 0x16f   : > { %v1157_v10 = vmul.f32 %v1897_v3, %v2460_v53  ;;  %v2501_v24 = vadd.f32 %v1085_v6, %v1069_v63  ;;  %v1086_v51 = vmul.f32 %v1726_v21, %v1726_v21  ;;  %v1155_v13 = vsel %vm1153_vm1, %v1154_v7, %v1152_v8 }
 0x170   : > { %1652 = vmatprep.mubr.f32.mxu1 %v1155_v13 }
 0x171   : > { %v1159_v27 = vsel %vm1158_vm2, %v2460_v53, %v1157_v10  ;;  %v2506_v52 = vadd.f32 %v1086_v51, %v1070_v5  ;;  %v1008_v16 = vpop.f32.mrb[24].mxu0  ;;  %1902 = vrsqrt.f32 %v2501_v24  ;;  %vm1179_vm8 = vcmp.eq.f32.partialorder %v2501_v24, inf }
 0x172   : > { %v1162_v17 = vsel %vm1160_vm3, %v1161_v14, %v1159_v27  ;;  %v1727_v55 = vadd.f32 %v1008_v16, %v2430_v48  ;;  %v1010_v18 = vpop.f32.mrb[25].mxu0  ;;  %vm1181_vm9 = vcmp.eq.f32.partialorder %v2501_v24, 0.0 }
 0x173   : > { %1653 = vmatmul.mubr.f32.gmra.mrb[38].mxu1 %v1162_v17  ;;  %v1899_v22 = vpop.eup %1898  ;;  %v1728_v33 = vadd.f32 %v1010_v18, %v2434_v56  ;;  %v1012_v58 = vpop.f32.mrb[26].mxu0  ;;  %1904 = vrsqrt.f32 %v2506_v52  ;;  %vm1186_vm10 = vcmp.eq.f32.partialorder %v2506_v52, inf  ;;  %v1189_v61 = vand.u32 2147483648, %v2506_v52 }
 0x174   : > { %v1071_v19 = vmul.f32 %v1727_v55, %v1727_v55  ;;  %v1729_v20 = vadd.f32 %v1012_v58, %v2437_v59  ;;  %v1014_v53 = vpop.f32.mrb[27].mxu0  ;;  %v1164_v25 = vmul.f32 %v1899_v22, %v2481_v12  ;;  %vm1188_vm11 = vcmp.eq.f32.partialorder %v2506_v52, 0.0 }
 0x175   : > { %v1087_v26 = vmul.f32 %v1728_v33, %v1728_v33  ;;  %v1730_v48 = vadd.f32 %v1014_v53, %v2440_v47 }
 0x176   : > { %v1901_v2 = vpop.eup %1900  ;;  %v1072_v56 = vmul.f32 %v1729_v20, %v1729_v20  ;;  %v1166_v62 = vsel %vm1165_vm4, %v2481_v12, %v1164_v25 }
 0x177   : > { %v1171_v30 = vmul.f32 %v1901_v2, %v2486_v45  ;;  %v1103_v59 = vadd.f32 %v1087_v26, %v1071_v19  ;;  %v1088_v31 = vmul.f32 %v1730_v48, %v1730_v48  ;;  %v1169_v32 = vsel %vm1167_vm5, %v1168_v29, %v1166_v62 }
 0x178   : > { %1655 = vmatprep.mubr.f32.mxu1 %v1169_v32 }
 0x179   : > { %v1173_v35 = vsel %vm1172_vm6, %v2486_v45, %v1171_v30  ;;  %v1104_v47 = vadd.f32 %v1088_v31, %v1072_v56  ;;  %v1018_v4 = vpop.f32.mrb[28].mxu0  ;;  %1906 = vrsqrt.f32 %v1103_v59  ;;  %vm1193_vm12 = vcmp.eq.f32.partialorder %v1103_v59, inf }
 0x17a   : > { %v1176_v36 = vsel %vm1174_vm7, %v1175_v34, %v1173_v35  ;;  %v1731_v38 = vadd.f32 %v1018_v4, %v2456_v37  ;;  %v1020_v9 = vpop.f32.mrb[29].mxu0  ;;  %v1182_v37 = vand.u32 2147483648, %v2501_v24  ;;  %v1196_v6 = vand.u32 2147483648, %v1103_v59 }
 0x17b   : > { %1656 = vmatmul.mubr.f32.gmra.mrb[40].mxu1 %v1176_v36  ;;  %v1903_v39 = vpop.eup %1902  ;;  %v1732_v40 = vadd.f32 %v1020_v9, %v2462_v11  ;;  %v1022_v12 = vpop.f32.mrb[30].mxu0  ;;  %1908 = vrsqrt.f32 %v1104_v47  ;;  %vm1195_vm13 = vcmp.eq.f32.partialorder %v1103_v59, 0.0  ;;  %vm1200_vm14 = vcmp.eq.f32.partialorder %v1104_v47, inf }
 0x17c   : > { %v1073_v41 = vmul.f32 %v1731_v38, %v1731_v38  ;;  %v1733_v42 = vadd.f32 %v1022_v12, %v2465_v23  ;;  %v1024_v44 = vpop.f32.mrb[31].mxu0  ;;  %v1178_v15 = vmul.f32 %v1903_v39, %v2501_v24  ;;  %v1203_v8 = vand.u32 2147483648, %v1104_v47 }
 0x17d   : > { %v1905_v45 = vpop.eup %1904  ;;  %v1089_v46 = vmul.f32 %v1732_v40, %v1732_v40  ;;  %v1734_v49 = vadd.f32 %v1024_v44, %v2468_v28  ;;  %vm1202_vm15 = vcmp.eq.f32.partialorder %v1104_v47, 0.0 }
 0x17e   : > { %v1074_v43 = vmul.f32 %v1733_v42, %v1733_v42  ;;  %v1180_v11 = vsel %vm1179_vm8, %v2501_v24, %v1178_v15  ;;  %v1185_v50 = vmul.f32 %v1905_v45, %v2506_v52 }
 0x17f   : > { %v1105_v23 = vadd.f32 %v1089_v46, %v1073_v41  ;;  %v1090_v57 = vmul.f32 %v1734_v49, %v1734_v49  ;;  %v1183_v60 = vsel %vm1181_vm9, %v1182_v37, %v1180_v11 }
 0x180   : > { %1658 = vmatprep.mubr.f32.mxu1 %v1183_v60  ;;  %v1187_v63 = vsel %vm1186_vm10, %v2506_v52, %v1185_v50 }
 0x181   : > { %v1106_v28 = vadd.f32 %v1090_v57, %v1074_v43  ;;  %v1190_v0 = vsel %vm1188_vm11, %v1189_v61, %v1187_v63  ;;  %1910 = vrsqrt.f32 %v1105_v23  ;;  %vm1207_vm0 = vcmp.eq.f32.partialorder %v1105_v23, inf }
 0x182   : > { %1659 = vmatmul.mubr.f32.gmra.mrb[42].mxu1 %v1190_v0  ;;  %v1210_v27 = vand.u32 2147483648, %v1105_v23  ;;  %vm1209_vm1 = vcmp.eq.f32.partialorder %v1105_v23, 0.0 }
 0x183   : > { %v1907_v54 = vpop.eup %1906  ;;  %1912 = vrsqrt.f32 %v1106_v28  ;;  %vm1214_vm2 = vcmp.eq.f32.partialorder %v1106_v28, inf  ;;  %v1217_v55 = vand.u32 2147483648, %v1106_v28  ;;  %vm1216_vm3 = vcmp.eq.f32.partialorder %v1106_v28, 0.0 }
 0x184   : > { %v1192_v1 = vmul.f32 %v1907_v54, %v1103_v59 }
 0x185   : > { %v1909_v3 = vpop.eup %1908 }
 0x186   : > { %v1194_v21 = vsel %vm1193_vm12, %v1103_v59, %v1192_v1  ;;  %v1199_v7 = vmul.f32 %v1909_v3, %v1104_v47 }
 0x187   : > { %v1197_v5 = vsel %vm1195_vm13, %v1196_v6, %v1194_v21 }
 0x188   : > { %1661 = vmatprep.mubr.f32.mxu1 %v1197_v5  ;;  %v1201_v10 = vsel %vm1200_vm14, %v1104_v47, %v1199_v7 }
 0x189   : > { %v1204_v24 = vsel %vm1202_vm15, %v1203_v8, %v1201_v10 }
 0x18a   : > { %1662 = vmatmul.mubr.f32.gmra.mrb[44].mxu1 %v1204_v24 }
 0x18b   : > { %v1911_v51 = vpop.eup %1910 }
 0x18c   : > { %v1206_v13 = vmul.f32 %v1911_v51, %v1105_v23 }
 0x18d   : > { %v1913_v14 = vpop.eup %1912 }
 0x18e   : > { %v1208_v52 = vsel %vm1207_vm0, %v1105_v23, %v1206_v13  ;;  %v1213_v16 = vmul.f32 %v1913_v14, %v1106_v28 }
 0x18f   : > { %v1211_v17 = vsel %vm1209_vm1, %v1210_v27, %v1208_v52 }
 0x190   : > { %1664 = vmatprep.mubr.f32.mxu1 %v1211_v17  ;;  %v1215_v18 = vsel %vm1214_vm2, %v1106_v28, %v1213_v16 }
 0x191   : > { %v1218_v22 = vsel %vm1216_vm3, %v1217_v55, %v1215_v18 }
 0x192   : > { %1665 = vmatmul.mubr.f32.gmra.mrb[46].mxu1 %v1218_v22 }
 0x22d   : > { %v1645_v33 = vpop.f32.mrb[32].mxu1 }
 0x22e   : > { %v1301_v58 = vpop.f32.mrb[33].mxu1 }
 0x22f   : > { %1380 = vxpose.xlu0.b32.start [1/16] (narrow) %v1301_v58, 16 }
 0x233   : > { %1381 = vxpose.xlu0.b32.cont [2/16] (narrow) %v1645_v33, 16 }
 0x235   : > { %v1648_v19 = vpop.f32.mrb[34].mxu1 }
 0x236   : > { %v1311_v20 = vpop.f32.mrb[35].mxu1 }
 0x237   : > { %1382 = vxpose.xlu0.b32.cont [3/16] (narrow) %v1311_v20, 16 }
 0x23b   : > { %1383 = vxpose.xlu0.b32.cont [4/16] (narrow) %v1648_v19, 16 }
 0x23e   : > { %v1651_v53 = vpop.f32.mrb[36].mxu1 }
 0x23f   : > { %v1321_v25 = vpop.f32.mrb[37].mxu1 }
 0x240   : > { %1384 = vxpose.xlu0.b32.cont [5/16] (narrow) %v1321_v25, 16 }
 0x244   : > { %1385 = vxpose.xlu0.b32.cont [6/16] (narrow) %v1651_v53, 16 }
 0x246   : > { %v1654_v2 = vpop.f32.mrb[38].mxu1 }
 0x247   : > { %v1331_v26 = vpop.f32.mrb[39].mxu1 }
 0x248   : > { %1386 = vxpose.xlu0.b32.cont [7/16] (narrow) %v1331_v26, 16 }
 0x24c   : > { %1387 = vxpose.xlu0.b32.cont [8/16] (narrow) %v1654_v2, 16 }
 0x24e   : > { %v1657_v48 = vpop.f32.mrb[40].mxu1 }
 0x24f   : > { %v1341_v29 = vpop.f32.mrb[41].mxu1 }
 0x250   : > { %1388 = vxpose.xlu0.b32.cont [9/16] (narrow) %v1341_v29, 16 }
 0x254   : > { %1389 = vxpose.xlu0.b32.cont [10/16] (narrow) %v1657_v48, 16 }
 0x255   : > { %v1660_v56 = vpop.f32.mrb[42].mxu1 }
 0x256   : > { %v1351_v62 = vpop.f32.mrb[43].mxu1 }
 0x258   : > { %1390 = vxpose.xlu0.b32.cont [11/16] (narrow) %v1351_v62, 16 }
 0x25c   : > { %1391 = vxpose.xlu0.b32.cont [12/16] (narrow) %v1660_v56, 16 }
 0x25d   : > { %v1663_v30 = vpop.f32.mrb[44].mxu1 }
 0x25e   : > { %v1361_v59 = vpop.f32.mrb[45].mxu1 }
 0x260   : > { %1392 = vxpose.xlu0.b32.cont [13/16] (narrow) %v1361_v59, 16 }
 0x264   : > { %1393 = vxpose.xlu0.b32.cont [14/16] (narrow) %v1663_v30, 16 }
 0x265   : > { %v1666_v31 = vpop.f32.mrb[46].mxu1 }
 0x266   : > { %v1371_v32 = vpop.f32.mrb[47].mxu1 }
 0x268   : > { %1394 = vxpose.xlu0.b32.cont [15/16] (narrow) %v1371_v32, 16 }
 0x26c   : > { %1395 = vxpose.xlu0.b32.end [16/16] (narrow) %v1666_v31, 16 }
 0x2b0   : > { %v1396_v34 = vpop.trf.xlu0 }
 0x2b1   : > { %v1412_v35 = vmax.f32 %v1396_v34, 1e-05 }
 0x2b3   : > { %1914 = vlog2.f32 %v1412_v35 }
 0x2b4   : > { %v1397_v47 = vpop.trf.xlu0 }
 0x2b5   : > { %v1413_v4 = vmax.f32 %v1397_v47, 1e-05 }
 0x2b7   : > { %1916 = vlog2.f32 %v1413_v4 }
 0x2bd   : > { %v1915_v36 = vpop.eup %1914 }
 0x2be   : > { %v1415_v38 = vmul.f32 0.6931472, %v1915_v36 }
 0x2c0   : > { %v1418_v9 = vmul.f32 0.4342945, %v1415_v38 }
 0x2c1   : > { %v1917_v39 = vpop.eup %1916 }
 0x2c2   : > { %1420 = vst [vmem:[%s187_s29] sm:$0xff] %v1418_v9  ;;  %v1417_v40 = vmul.f32 0.6931472, %v1917_v39 }
 0x2c4   : > { %v1419_v12 = vmul.f32 0.4342945, %v1417_v40 }
 0x2c6   : > { %1421 = vst [vmem:[%s187_s29 + $0x8] sm:$0xff] %v1419_v12 }
 0x2c7   : > { %1931 = shalt.err (!%p1928_p5)
}
 0x2c8   : > { %s1932_s18 = scalar_lea.hbm %s2545_s7, 256  ;;  %s1936_s23 = scalar_lea.hbm %s2596_s3, 512 }
 0x2c9   : > { %p1933_p6 = scmp.ne.s32.totalorder %s2545_s7, %s1932_s18  ;;  %p1937_p10 = scmp.lt.u32.totalorder %s2545_s7, %s2596_s3 }
 0x2ca   : > { %p1938_p11 = scmp.lt.u32.totalorder %s1936_s23, %s1932_s18  ;;  %p1940_p13 = scmp.lt.u32.totalorder %s1932_s18, %s2545_s7 }
 0x2cb   : > { %p1934_p7 = pnand %p1933_p6, %p2062_p4 }
 0x2cc   : > { %p1939_p12 = por %p1938_p11, %p1937_p10 }
 0x2cd   : > { %p1935_p9 = pneg %p1934_p7 }
 0x2ce   : > { %p1941_p0 = por %p1940_p13, %p1939_p12 }
 0x2d0   : > { %p1942_p1 = pnand %p1941_p0, %p1935_p9 }
 0x2d2   : > { %1945 = shalt.err (!%p1942_p1)
}
 0x2d3   : > { %s2000_s28 = smov 128   ;;  %s2001_s29 = smov 8  }
 0x2d4   : > { %1800 = dma.vmem_to_hbm [thread:$0]  (%p2062_p4), %s2540_s30, 256, %s2545_s7, %s2547_s8, %s2000_s28, %s2000_s28, %s2001_s29  }
 0x2d5 PF: > { %p1806_p2 = scmp.ge.s32.totalorder %s1996_s17, 2  ;;  %s1452_s4 = sand.u32 1, %s1976_s12  }
 0x2d6   : > { %s1453_s5 = scalar_lea.sflag [#allocation3], %s1452_s4 }
 0x2d7   : > { %p1803_p3 = pnand %p1806_p2, %p2069_p8 }
 0x2d9   : > { %1971 = dma.done.wait (!%p1803_p3), %s1453_s5, 256  }
 0x2da   : > { %1973 = vsyncadd (!%p1803_p3), %s1453_s5, 4294967040  ;;  %s16_s17 = sadd.s32 1, %s1996_s17   ;;  %s2599_s12 = smov %s1980_s13 }
 0x2db   : > { %p13_p5 = scmp.ge.s32.totalorder %s16_s17, 4   ;;  %s2600_s13 = smov %s1984_s14 }
 0x2dc   : > { %s2601_s14 = smov %s2075_s25  ;;  %s2602_s15 = smov %s1992_s16 }
 0x2dd   : > { %s2603_s16 = smov %s2605_s20  ;;  %15 = sbr.rel (!%p13_p5) target bundleno = 4 (0x4), region = 67 }
 0x2e4   :  { %1458 = vsyncpa [#allocation3], 1 }
 0x2e5   :  { %1460 = vsyncpa [#allocation3 + $0x1], 1 }

</bundles_post_ra>
